<compile_context>
chip_gen: v7x
topology: tpu7x:2x2x1
jax: 0.10.0
libtpu: 0.0.40
codegen_flags: <defaults>
</compile_context>

<pallas_src>
import jax
import jax.numpy as jnp
import numpy as np
from jax.experimental import pallas as pl
from jax.experimental.pallas import tpu as pltpu

HIDDEN_DIMS = [20] * 8
RHO = 1.0
MU = 0.01

FEAT = 24     # feature width padded 20 -> 24 (sublane multiple of 8)
IN_PAD = 8    # input feature count padded 3 -> 8 (row 3 is the constant-1 bias row)
TB_MAX = 1024  # upper bound on the batch tile (lane axis)


def pinn_kernel(inp_ref, w0_ref, w_ref, aux_ref, out_ref):
    """Fused forward + JVP, transposed (feature-on-sublane, batch-on-lane) layout.

    inp_ref : (IN_PAD, TB)     rows 0..2 = t, u, v; row 3 = 1.0 (bias); rest zero
    w0_ref  : (FEAT, IN_PAD)   layer-0 weight (out, in); column 3 holds b0
    w_ref   : (7, FEAT, FEAT)  hidden layers 1..7 weights (out, in), zero padded
    aux_ref : (9, FEAT, 1)     slots 0..6 = biases of layers 1..7;
                               slot 7 = W0[:, 1] (tangent seed d z0 / d u);
                               slot 8 = final weight W8 row stored as a column
    out_ref : (1, TB)          preds = rho/mu * d psi / d u
    """
    x = inp_ref[...]                                                    # (IN_PAD, TB)

    # ---- layer 0: primal matmul (bias folded into col 3 of W0 via the 1-row);
    #      tangent of z0 w.r.t. u is just column 1 of W0 (lane-broadcast).
    z0 = jnp.dot(w0_ref[...], x, preferred_element_type=jnp.float32)    # (FEAT, TB)
    h = jnp.tanh(z0)
    dh = aux_ref[7] * (1.0 - h * h)

    # ---- hidden layers 1..7: two dots sharing the same stationary weight.
    for i in range(7):
        w = w_ref[i]                                                    # (FEAT, FEAT)
        z = jnp.dot(w, h, preferred_element_type=jnp.float32) + aux_ref[i]
        dz = jnp.dot(w, dh, preferred_element_type=jnp.float32)
        h = jnp.tanh(z)
        dh = dz * (1.0 - h * h)                                         # tanh'(z) = 1 - tanh^2

    # ---- final linear layer: psi itself is never needed, only d psi / d u.
    #      Only output row 0 is nonzero -> VPU multiply + sublane reduce (XLU),
    #      no MXU drain of zero rows.  Final bias drops out of the gradient.
    out_ref[...] = (RHO / MU) * jnp.sum(aux_ref[8] * dh, axis=0, keepdims=True)


def init_params(key, hidden_dims):
    """Xavier-uniform weights stored torch-style as (out, in); zero biases."""
    dims = [3] + list(hidden_dims) + [1]
    params = []
    for i in range(len(dims) - 1):
        fan_in, fan_out = dims[i], dims[i + 1]
        key, sub = jax.random.split(key)
        bound = float(np.sqrt(6.0 / (fan_in + fan_out)))
        w = jax.random.uniform(sub, (fan_out, fan_in), jnp.float32, -bound, bound)
        b = jnp.zeros((fan_out,), jnp.float32)
        params.append((w, b))
    return params


def pack_params(params):
    """Pack the 9 (W, b) pairs into three padded, kernel-resident slabs.

    Call ONCE per parameter set and reuse the result (hoisted out of the
    per-forward path).
    """
    assert len(params) == 9
    w0 = jnp.zeros((FEAT, IN_PAD), jnp.float32)
    w0 = w0.at[:20, :3].set(params[0][0])
    w0 = w0.at[:20, 3].set(params[0][1])            # b0 folded (input row 3 == 1.0)

    w_rest = jnp.zeros((7, FEAT, FEAT), jnp.float32)
    aux = jnp.zeros((9, FEAT, 1), jnp.float32)
    for j in range(1, 8):                            # hidden layers 1..7
        w_rest = w_rest.at[j - 1, :20, :20].set(params[j][0])
        aux = aux.at[j - 1, :20, 0].set(params[j][1])
    aux = aux.at[7, :20, 0].set(params[0][0][:, 1])  # tangent seed: W0[:, 1]
    aux = aux.at[8, :20, 0].set(params[8][0][0, :])  # final weight W8 as a column
    # params[8][1] (final bias) does not affect d psi / d u -> intentionally dropped.
    return w0, w_rest, aux


def _choose_tb(b):
    """Pick the batch tile: >=2 tiles when possible (v7x megacore), no 512-lane
    padding for tiny batches, growing up to TB_MAX for large batches."""
    b128 = ((b + 127) // 128) * 128
    if b128 <= 128:
        return 128
    half = (b128 // 2) // 128 * 128
    return int(min(TB_MAX, max(128, half)))


def pinn_forward(t, u, v, packed, Re=None, tb=None):
    w0p, w_rest, aux = packed
    b = t.shape[0]
    if tb is None:
        tb = _choose_tb(b)
    n_tiles = pl.cdiv(b, tb)
    b_pad = n_tiles * tb

    # Transposed input slab: (IN_PAD, b_pad), rows 0..2 = t, u, v; row 3 = 1.
    inp = jnp.zeros((IN_PAD, b_pad), jnp.float32)
    inp = inp.at[0, :b].set(t.astype(jnp.float32))
    inp = inp.at[1, :b].set(u.astype(jnp.float32))
    inp = inp.at[2, :b].set(v.astype(jnp.float32))
    inp = inp.at[3, :].set(1.0)                      # bias lane for layer 0

    cost = pl.CostEstimate(
        flops=int(b_pad * (2 * FEAT * IN_PAD + 7 * 2 * (2 * FEAT * FEAT) + 2 * FEAT)),
        transcendentals=int(b_pad * 8 * FEAT),
        bytes_accessed=int(b_pad * 4 * (IN_PAD + 1)
                           + 4 * (w0p.size + w_rest.size + aux.size)),
    )

    out = pl.pallas_call(
        pinn_kernel,
        out_shape=jax.ShapeDtypeStruct((1, b_pad), jnp.float32),
        grid=(n_tiles,),
        in_specs=[
            pl.BlockSpec((IN_PAD, tb), lambda i: (0, i)),        # batch stream
            pl.BlockSpec((FEAT, IN_PAD), lambda i: (0, 0)),      # resident W0
            pl.BlockSpec((7, FEAT, FEAT), lambda i: (0, 0, 0)),  # resident W1..W7
            pl.BlockSpec((9, FEAT, 1), lambda i: (0, 0, 0)),     # biases / seed / W8
        ],
        out_specs=pl.BlockSpec((1, tb), lambda i: (0, i)),
        compiler_params=pltpu.CompilerParams(
            dimension_semantics=("parallel",)),                   # megacore on v7x
        cost_estimate=cost,
    )(inp, w0p, w_rest, aux)

    preds = out[0, :b]
    return {"preds": preds, "label": Re}


def _reference_preds(t, u, v, params):
    """Pure-JAX reference: forward MLP + JVP w.r.t. the u column."""
    def mlp(inp):
        h = inp
        for i, (w, b) in enumerate(params):
            h = h @ w.T + b
            if i < len(params) - 1:
                h = jnp.tanh(h)
        return h[:, 0]

    inp = jnp.stack([t, u, v], axis=1)
    tangent = jnp.zeros_like(inp).at[:, 1].set(1.0)
    _, dpsi_du = jax.jvp(mlp, (inp,), (tangent,))
    return (RHO / MU) * dpsi_du


if __name__ == "__main__":
    key = jax.random.PRNGKey(0)
    k_t, k_u, k_v, k_re, k_p = jax.random.split(key, 5)

    b = 64
    t = jax.random.normal(k_t, (b,), jnp.float32)
    u = jax.random.normal(k_u, (b,), jnp.float32)
    v = jax.random.normal(k_v, (b,), jnp.float32)
    Re = jax.random.uniform(k_re, (b,), jnp.float32, 10.0, 100.0)

    params = init_params(k_p, HIDDEN_DIMS)
    packed = pack_params(params)   # built once, reused across forward calls

    out = pinn_forward(t, u, v, packed, Re=Re)
    preds = jax.block_until_ready(out["preds"])

    ref = _reference_preds(t, u, v, params)
    np.testing.assert_allclose(np.asarray(preds), np.asarray(ref), rtol=5e-4, atol=5e-4)

    assert preds.shape == (b,)
    assert out["label"].shape == (b,)
    print("KERNEL_OK")
</pallas_src>

<mosaic_0001>
module attributes {stable_mosaic.version = 11 : i64} {
  func.func @pinn_kernel(%arg0: i32, %arg1: memref<8x128xf32, #tpu.memory_space<vmem>>, %arg2: memref<24x8xf32, #tpu.memory_space<vmem>>, %arg3: memref<7x24x24xf32, #tpu.memory_space<vmem>>, %arg4: memref<9x24x1xf32, #tpu.memory_space<vmem>>, %arg5: memref<1x128xf32, #tpu.memory_space<vmem>>) attributes {dimension_semantics = [#tpu.dimension_semantics<parallel>], iteration_bounds = array<i64: 1>, scalar_prefetch = 0 : i64, scratch_operands = 0 : i64, tpu.core_type = #tpu.core_type<tc>, window_params = [{transform_indices = @transform_0, window_bounds = array<i64: 8, 128>}, {pipeline_mode = #tpu.pipeline_mode<synchronous>, transform_indices = @transform_1, window_bounds = array<i64: 24, 8>}, {pipeline_mode = #tpu.pipeline_mode<synchronous>, transform_indices = @transform_2, window_bounds = array<i64: 7, 24, 24>}, {pipeline_mode = #tpu.pipeline_mode<synchronous>, transform_indices = @transform_3, window_bounds = array<i64: 9, 24, 1>}, {transform_indices = @transform_4, window_bounds = array<i64: 1, 128>}]} {
    %c0 = arith.constant 0 : index
    %c0_0 = arith.constant 0 : index
    %0 = vector.load %arg1[%c0, %c0_0] : memref<8x128xf32, #tpu.memory_space<vmem>>, vector<8x128xf32>
    %c0_1 = arith.constant 0 : index
    %c0_2 = arith.constant 0 : index
    %1 = vector.load %arg2[%c0_1, %c0_2] : memref<24x8xf32, #tpu.memory_space<vmem>>, vector<24x8xf32>
    %cst = arith.constant dense<0.000000e+00> : vector<24x128xf32>
    %2 = tpu.matmul %1, %0, %cst {dimension_numbers = #tpu.dot_dimension_numbers<[1], [0], [0], [1], [0, 0, 1, 1], [], []>} : vector<24x8xf32>, vector<8x128xf32>, vector<24x128xf32> -> vector<24x128xf32>
    %3 = math.tanh %2 : vector<24x128xf32>
    %c7 = arith.constant 7 : index
    %c0_3 = arith.constant 0 : index
    %c0_4 = arith.constant 0 : index
    %4 = vector.load %arg4[%c7, %c0_3, %c0_4] : memref<9x24x1xf32, #tpu.memory_space<vmem>>, vector<1x24x1xf32>
    %5 = vector.shape_cast %4 : vector<1x24x1xf32> to vector<24x1xf32>
    %6 = arith.mulf %3, %3 : vector<24x128xf32>
    %cst_5 = arith.constant 1.000000e+00 : f32
    %7 = vector.broadcast %cst_5 : f32 to vector<24x128xf32>
    %8 = arith.subf %7, %6 : vector<24x128xf32>
    %9 = vector.broadcast %5 : vector<24x1xf32> to vector<24x128xf32>
    %10 = arith.mulf %9, %8 : vector<24x128xf32>
    %c0_6 = arith.constant 0 : index
    %c0_7 = arith.constant 0 : index
    %c0_8 = arith.constant 0 : index
    %11 = vector.load %arg3[%c0_6, %c0_7, %c0_8] : memref<7x24x24xf32, #tpu.memory_space<vmem>>, vector<1x24x24xf32>
    %12 = vector.shape_cast %11 : vector<1x24x24xf32> to vector<24x24xf32>
    %cst_9 = arith.constant dense<0.000000e+00> : vector<24x128xf32>
    %13 = tpu.matmul %12, %3, %cst_9 {dimension_numbers = #tpu.dot_dimension_numbers<[1], [0], [0], [1], [0, 0, 1, 1], [], []>} : vector<24x24xf32>, vector<24x128xf32>, vector<24x128xf32> -> vector<24x128xf32>
    %c0_10 = arith.constant 0 : index
    %c0_11 = arith.constant 0 : index
    %c0_12 = arith.constant 0 : index
    %14 = vector.load %arg4[%c0_10, %c0_11, %c0_12] : memref<9x24x1xf32, #tpu.memory_space<vmem>>, vector<1x24x1xf32>
    %15 = vector.shape_cast %14 : vector<1x24x1xf32> to vector<24x1xf32>
    %16 = vector.broadcast %15 : vector<24x1xf32> to vector<24x128xf32>
    %17 = arith.addf %13, %16 : vector<24x128xf32>
    %cst_13 = arith.constant dense<0.000000e+00> : vector<24x128xf32>
    %18 = tpu.matmul %12, %10, %cst_13 {dimension_numbers = #tpu.dot_dimension_numbers<[1], [0], [0], [1], [0, 0, 1, 1], [], []>} : vector<24x24xf32>, vector<24x128xf32>, vector<24x128xf32> -> vector<24x128xf32>
    %19 = math.tanh %17 : vector<24x128xf32>
    %20 = arith.mulf %19, %19 : vector<24x128xf32>
    %cst_14 = arith.constant 1.000000e+00 : f32
    %21 = vector.broadcast %cst_14 : f32 to vector<24x128xf32>
    %22 = arith.subf %21, %20 : vector<24x128xf32>
    %23 = arith.mulf %18, %22 : vector<24x128xf32>
    %c1 = arith.constant 1 : index
    %c0_15 = arith.constant 0 : index
    %c0_16 = arith.constant 0 : index
    %24 = vector.load %arg3[%c1, %c0_15, %c0_16] : memref<7x24x24xf32, #tpu.memory_space<vmem>>, vector<1x24x24xf32>
    %25 = vector.shape_cast %24 : vector<1x24x24xf32> to vector<24x24xf32>
    %cst_17 = arith.constant dense<0.000000e+00> : vector<24x128xf32>
    %26 = tpu.matmul %25, %19, %cst_17 {dimension_numbers = #tpu.dot_dimension_numbers<[1], [0], [0], [1], [0, 0, 1, 1], [], []>} : vector<24x24xf32>, vector<24x128xf32>, vector<24x128xf32> -> vector<24x128xf32>
    %c1_18 = arith.constant 1 : index
    %c0_19 = arith.constant 0 : index
    %c0_20 = arith.constant 0 : index
    %27 = vector.load %arg4[%c1_18, %c0_19, %c0_20] : memref<9x24x1xf32, #tpu.memory_space<vmem>>, vector<1x24x1xf32>
    %28 = vector.shape_cast %27 : vector<1x24x1xf32> to vector<24x1xf32>
    %29 = vector.broadcast %28 : vector<24x1xf32> to vector<24x128xf32>
    %30 = arith.addf %26, %29 : vector<24x128xf32>
    %cst_21 = arith.constant dense<0.000000e+00> : vector<24x128xf32>
    %31 = tpu.matmul %25, %23, %cst_21 {dimension_numbers = #tpu.dot_dimension_numbers<[1], [0], [0], [1], [0, 0, 1, 1], [], []>} : vector<24x24xf32>, vector<24x128xf32>, vector<24x128xf32> -> vector<24x128xf32>
    %32 = math.tanh %30 : vector<24x128xf32>
    %33 = arith.mulf %32, %32 : vector<24x128xf32>
    %cst_22 = arith.constant 1.000000e+00 : f32
    %34 = vector.broadcast %cst_22 : f32 to vector<24x128xf32>
    %35 = arith.subf %34, %33 : vector<24x128xf32>
    %36 = arith.mulf %31, %35 : vector<24x128xf32>
    %c2 = arith.constant 2 : index
    %c0_23 = arith.constant 0 : index
    %c0_24 = arith.constant 0 : index
    %37 = vector.load %arg3[%c2, %c0_23, %c0_24] : memref<7x24x24xf32, #tpu.memory_space<vmem>>, vector<1x24x24xf32>
    %38 = vector.shape_cast %37 : vector<1x24x24xf32> to vector<24x24xf32>
    %cst_25 = arith.constant dense<0.000000e+00> : vector<24x128xf32>
    %39 = tpu.matmul %38, %32, %cst_25 {dimension_numbers = #tpu.dot_dimension_numbers<[1], [0], [0], [1], [0, 0, 1, 1], [], []>} : vector<24x24xf32>, vector<24x128xf32>, vector<24x128xf32> -> vector<24x128xf32>
    %c2_26 = arith.constant 2 : index
    %c0_27 = arith.constant 0 : index
    %c0_28 = arith.constant 0 : index
    %40 = vector.load %arg4[%c2_26, %c0_27, %c0_28] : memref<9x24x1xf32, #tpu.memory_space<vmem>>, vector<1x24x1xf32>
    %41 = vector.shape_cast %40 : vector<1x24x1xf32> to vector<24x1xf32>
    %42 = vector.broadcast %41 : vector<24x1xf32> to vector<24x128xf32>
    %43 = arith.addf %39, %42 : vector<24x128xf32>
    %cst_29 = arith.constant dense<0.000000e+00> : vector<24x128xf32>
    %44 = tpu.matmul %38, %36, %cst_29 {dimension_numbers = #tpu.dot_dimension_numbers<[1], [0], [0], [1], [0, 0, 1, 1], [], []>} : vector<24x24xf32>, vector<24x128xf32>, vector<24x128xf32> -> vector<24x128xf32>
    %45 = math.tanh %43 : vector<24x128xf32>
    %46 = arith.mulf %45, %45 : vector<24x128xf32>
    %cst_30 = arith.constant 1.000000e+00 : f32
    %47 = vector.broadcast %cst_30 : f32 to vector<24x128xf32>
    %48 = arith.subf %47, %46 : vector<24x128xf32>
    %49 = arith.mulf %44, %48 : vector<24x128xf32>
    %c3 = arith.constant 3 : index
    %c0_31 = arith.constant 0 : index
    %c0_32 = arith.constant 0 : index
    %50 = vector.load %arg3[%c3, %c0_31, %c0_32] : memref<7x24x24xf32, #tpu.memory_space<vmem>>, vector<1x24x24xf32>
    %51 = vector.shape_cast %50 : vector<1x24x24xf32> to vector<24x24xf32>
    %cst_33 = arith.constant dense<0.000000e+00> : vector<24x128xf32>
    %52 = tpu.matmul %51, %45, %cst_33 {dimension_numbers = #tpu.dot_dimension_numbers<[1], [0], [0], [1], [0, 0, 1, 1], [], []>} : vector<24x24xf32>, vector<24x128xf32>, vector<24x128xf32> -> vector<24x128xf32>
    %c3_34 = arith.constant 3 : index
    %c0_35 = arith.constant 0 : index
    %c0_36 = arith.constant 0 : index
    %53 = vector.load %arg4[%c3_34, %c0_35, %c0_36] : memref<9x24x1xf32, #tpu.memory_space<vmem>>, vector<1x24x1xf32>
    %54 = vector.shape_cast %53 : vector<1x24x1xf32> to vector<24x1xf32>
    %55 = vector.broadcast %54 : vector<24x1xf32> to vector<24x128xf32>
    %56 = arith.addf %52, %55 : vector<24x128xf32>
    %cst_37 = arith.constant dense<0.000000e+00> : vector<24x128xf32>
    %57 = tpu.matmul %51, %49, %cst_37 {dimension_numbers = #tpu.dot_dimension_numbers<[1], [0], [0], [1], [0, 0, 1, 1], [], []>} : vector<24x24xf32>, vector<24x128xf32>, vector<24x128xf32> -> vector<24x128xf32>
    %58 = math.tanh %56 : vector<24x128xf32>
    %59 = arith.mulf %58, %58 : vector<24x128xf32>
    %cst_38 = arith.constant 1.000000e+00 : f32
    %60 = vector.broadcast %cst_38 : f32 to vector<24x128xf32>
    %61 = arith.subf %60, %59 : vector<24x128xf32>
    %62 = arith.mulf %57, %61 : vector<24x128xf32>
    %c4 = arith.constant 4 : index
    %c0_39 = arith.constant 0 : index
    %c0_40 = arith.constant 0 : index
    %63 = vector.load %arg3[%c4, %c0_39, %c0_40] : memref<7x24x24xf32, #tpu.memory_space<vmem>>, vector<1x24x24xf32>
    %64 = vector.shape_cast %63 : vector<1x24x24xf32> to vector<24x24xf32>
    %cst_41 = arith.constant dense<0.000000e+00> : vector<24x128xf32>
    %65 = tpu.matmul %64, %58, %cst_41 {dimension_numbers = #tpu.dot_dimension_numbers<[1], [0], [0], [1], [0, 0, 1, 1], [], []>} : vector<24x24xf32>, vector<24x128xf32>, vector<24x128xf32> -> vector<24x128xf32>
    %c4_42 = arith.constant 4 : index
    %c0_43 = arith.constant 0 : index
    %c0_44 = arith.constant 0 : index
    %66 = vector.load %arg4[%c4_42, %c0_43, %c0_44] : memref<9x24x1xf32, #tpu.memory_space<vmem>>, vector<1x24x1xf32>
    %67 = vector.shape_cast %66 : vector<1x24x1xf32> to vector<24x1xf32>
    %68 = vector.broadcast %67 : vector<24x1xf32> to vector<24x128xf32>
    %69 = arith.addf %65, %68 : vector<24x128xf32>
    %cst_45 = arith.constant dense<0.000000e+00> : vector<24x128xf32>
    %70 = tpu.matmul %64, %62, %cst_45 {dimension_numbers = #tpu.dot_dimension_numbers<[1], [0], [0], [1], [0, 0, 1, 1], [], []>} : vector<24x24xf32>, vector<24x128xf32>, vector<24x128xf32> -> vector<24x128xf32>
    %71 = math.tanh %69 : vector<24x128xf32>
    %72 = arith.mulf %71, %71 : vector<24x128xf32>
    %cst_46 = arith.constant 1.000000e+00 : f32
    %73 = vector.broadcast %cst_46 : f32 to vector<24x128xf32>
    %74 = arith.subf %73, %72 : vector<24x128xf32>
    %75 = arith.mulf %70, %74 : vector<24x128xf32>
    %c5 = arith.constant 5 : index
    %c0_47 = arith.constant 0 : index
    %c0_48 = arith.constant 0 : index
    %76 = vector.load %arg3[%c5, %c0_47, %c0_48] : memref<7x24x24xf32, #tpu.memory_space<vmem>>, vector<1x24x24xf32>
    %77 = vector.shape_cast %76 : vector<1x24x24xf32> to vector<24x24xf32>
    %cst_49 = arith.constant dense<0.000000e+00> : vector<24x128xf32>
    %78 = tpu.matmul %77, %71, %cst_49 {dimension_numbers = #tpu.dot_dimension_numbers<[1], [0], [0], [1], [0, 0, 1, 1], [], []>} : vector<24x24xf32>, vector<24x128xf32>, vector<24x128xf32> -> vector<24x128xf32>
    %c5_50 = arith.constant 5 : index
    %c0_51 = arith.constant 0 : index
    %c0_52 = arith.constant 0 : index
    %79 = vector.load %arg4[%c5_50, %c0_51, %c0_52] : memref<9x24x1xf32, #tpu.memory_space<vmem>>, vector<1x24x1xf32>
    %80 = vector.shape_cast %79 : vector<1x24x1xf32> to vector<24x1xf32>
    %81 = vector.broadcast %80 : vector<24x1xf32> to vector<24x128xf32>
    %82 = arith.addf %78, %81 : vector<24x128xf32>
    %cst_53 = arith.constant dense<0.000000e+00> : vector<24x128xf32>
    %83 = tpu.matmul %77, %75, %cst_53 {dimension_numbers = #tpu.dot_dimension_numbers<[1], [0], [0], [1], [0, 0, 1, 1], [], []>} : vector<24x24xf32>, vector<24x128xf32>, vector<24x128xf32> -> vector<24x128xf32>
    %84 = math.tanh %82 : vector<24x128xf32>
    %85 = arith.mulf %84, %84 : vector<24x128xf32>
    %cst_54 = arith.constant 1.000000e+00 : f32
    %86 = vector.broadcast %cst_54 : f32 to vector<24x128xf32>
    %87 = arith.subf %86, %85 : vector<24x128xf32>
    %88 = arith.mulf %83, %87 : vector<24x128xf32>
    %c6 = arith.constant 6 : index
    %c0_55 = arith.constant 0 : index
    %c0_56 = arith.constant 0 : index
    %89 = vector.load %arg3[%c6, %c0_55, %c0_56] : memref<7x24x24xf32, #tpu.memory_space<vmem>>, vector<1x24x24xf32>
    %90 = vector.shape_cast %89 : vector<1x24x24xf32> to vector<24x24xf32>
    %cst_57 = arith.constant dense<0.000000e+00> : vector<24x128xf32>
    %91 = tpu.matmul %90, %84, %cst_57 {dimension_numbers = #tpu.dot_dimension_numbers<[1], [0], [0], [1], [0, 0, 1, 1], [], []>} : vector<24x24xf32>, vector<24x128xf32>, vector<24x128xf32> -> vector<24x128xf32>
    %c6_58 = arith.constant 6 : index
    %c0_59 = arith.constant 0 : index
    %c0_60 = arith.constant 0 : index
    %92 = vector.load %arg4[%c6_58, %c0_59, %c0_60] : memref<9x24x1xf32, #tpu.memory_space<vmem>>, vector<1x24x1xf32>
    %93 = vector.shape_cast %92 : vector<1x24x1xf32> to vector<24x1xf32>
    %94 = vector.broadcast %93 : vector<24x1xf32> to vector<24x128xf32>
    %95 = arith.addf %91, %94 : vector<24x128xf32>
    %cst_61 = arith.constant dense<0.000000e+00> : vector<24x128xf32>
    %96 = tpu.matmul %90, %88, %cst_61 {dimension_numbers = #tpu.dot_dimension_numbers<[1], [0], [0], [1], [0, 0, 1, 1], [], []>} : vector<24x24xf32>, vector<24x128xf32>, vector<24x128xf32> -> vector<24x128xf32>
    %97 = math.tanh %95 : vector<24x128xf32>
    %98 = arith.mulf %97, %97 : vector<24x128xf32>
    %cst_62 = arith.constant 1.000000e+00 : f32
    %99 = vector.broadcast %cst_62 : f32 to vector<24x128xf32>
    %100 = arith.subf %99, %98 : vector<24x128xf32>
    %101 = arith.mulf %96, %100 : vector<24x128xf32>
    %c8 = arith.constant 8 : index
    %c0_63 = arith.constant 0 : index
    %c0_64 = arith.constant 0 : index
    %102 = vector.load %arg4[%c8, %c0_63, %c0_64] : memref<9x24x1xf32, #tpu.memory_space<vmem>>, vector<1x24x1xf32>
    %103 = vector.shape_cast %102 : vector<1x24x1xf32> to vector<24x1xf32>
    %104 = vector.broadcast %103 : vector<24x1xf32> to vector<24x128xf32>
    %105 = arith.mulf %104, %101 : vector<24x128xf32>
    %cst_65 = arith.constant dense<0.000000e+00> : vector<128xf32>
    %106 = vector.multi_reduction <add>, %105, %cst_65 [0] : vector<24x128xf32> to vector<128xf32>
    %107 = vector.shape_cast %106 : vector<128xf32> to vector<1x128xf32>
    %cst_66 = arith.constant 1.000000e+02 : f32
    %108 = vector.broadcast %cst_66 : f32 to vector<1x128xf32>
    %109 = arith.mulf %108, %107 : vector<1x128xf32>
    %c0_67 = arith.constant 0 : index
    %c0_68 = arith.constant 0 : index
    %110 = vector.load %arg5[%c0_67, %c0_68] : memref<1x128xf32, #tpu.memory_space<vmem>>, vector<1x128xf32>
    tpu.vector_store %arg5[%c0_67, %c0_68], %109 {strides = array<i32>} : memref<1x128xf32, #tpu.memory_space<vmem>>, vector<1x128xf32>,
    return
  }
  func.func @transform_0(%arg0: i32) -> (i32, i32) {
    %c0_i32 = arith.constant 0 : i32
    %c0_i32_0 = arith.constant 0 : i32
    return %c0_i32, %arg0 : i32, i32
  }
  func.func @transform_1(%arg0: i32) -> (i32, i32) {
    %c0_i32 = arith.constant 0 : i32
    %c0_i32_0 = arith.constant 0 : i32
    %c0_i32_1 = arith.constant 0 : i32
    return %c0_i32, %c0_i32_0 : i32, i32
  }
  func.func @transform_2(%arg0: i32) -> (i32, i32, i32) {
    %c0_i32 = arith.constant 0 : i32
    %c0_i32_0 = arith.constant 0 : i32
    %c0_i32_1 = arith.constant 0 : i32
    %c0_i32_2 = arith.constant 0 : i32
    return %c0_i32, %c0_i32_0, %c0_i32_1 : i32, i32, i32
  }
  func.func @transform_3(%arg0: i32) -> (i32, i32, i32) {
    %c0_i32 = arith.constant 0 : i32
    %c0_i32_0 = arith.constant 0 : i32
    %c0_i32_1 = arith.constant 0 : i32
    %c0_i32_2 = arith.constant 0 : i32
    return %c0_i32, %c0_i32_0, %c0_i32_1 : i32, i32, i32
  }
  func.func @transform_4(%arg0: i32) -> (i32, i32) {
    %c0_i32 = arith.constant 0 : i32
    %c0_i32_0 = arith.constant 0 : i32
    return %c0_i32, %arg0 : i32, i32
  }
}

</mosaic_0001>

<bundles_post_ra>
// kernel: tpu_custom_call.1
= control target key start
LH: loop header
LB: loop body
LE: loop exit
PB: predicated region body
PF: predicated region fallthrough
CT: control target
= control target key end

     0   :  { %vm22_vm0 = vcmask 64512   ;;  %v2135_v2 = vmov 0.0   ;;  %vm2136_vm1 = vmmov 0   ;;  %v2137_v7 = vmov 0   ;;  %s2498_s0 = inlined_call_operand.vmem [shape: f32[8,128], index: 0, kind: input, shape index: {}]   ;;  %s2499_s1 = inlined_call_operand.vmem [shape: f32[24,8], index: 1, kind: input, shape index: {}]   ;;  %s2500_s2 = inlined_call_operand.vmem [shape: f32[7,24,24], index: 2, kind: input, shape index: {}]   ;;  %s2501_s3 = inlined_call_operand.vmem [shape: f32[9,24,1], index: 3, kind: input, shape index: {}]   ;;  %s2502_s4 = inlined_call_operand.hbm [shape: f32[1,128], index: 4, kind: output, shape index: {}]  }
   0x1   :  { %v18_v0 = vld [vmem:[%s2498_s0] sm:$0xff]  ;;  %1791 = vmatprep.subr.mxu0 %v2135_v2  ;;  %1793 = vmatprep.mubr.msk.f32.mxu0 %vm2136_vm1, %v2135_v2  ;;  %v21_v3 = vld [vmem:[%s2499_s1 + $0x10] sm:$0xff]  ;;  %v1619_v4 = vld [vmem:[%s2501_s3 + $0xa8] sm:$0xff] }
   0x2   :  { %v19_v1 = vld [vmem:[%s2499_s1] sm:$0xff]  ;;  %1792 = vmatpush3.msra.mxu0 %v18_v0  ;;  %2054 = vmatprep.subr.mxu1 %v2135_v2  ;;  %v20_v5 = vld [vmem:[%s2499_s1 + $0x8] sm:$0xff]  ;;  %v1621_v6 = vld [vmem:[%s2501_s3 + $0xb8] sm:$0xff] }
   0x3   :  { %1794 = vmatmul.mubr.msk.f32.vlgmr.msra.gmra.mrb[0].mxu0 %vm22_vm0, %v19_v1  ;;  %2055 = vmatpush3.msra.mxu1 %v18_v0  ;;  %v1620_v8 = vld [vmem:[%s2501_s3 + $0xb0] sm:$0xff]  ;;  %v146_v9 = vld [vmem:[%s2501_s3] sm:$0xff] }
   0x4   :  { %1796 = vmatprep.mubr.msk.f32.mxu0 %vm2136_vm1, %v2135_v2  ;;  %1799 = vmatprep.mubr.msk.f32.mxu1 %vm2136_vm1, %v2135_v2 }
   0x5   :  { %1800 = vmatmul.mubr.msk.f32.vlgmr.msra.gmra.mrb[0].mxu1 %vm22_vm0, %v21_v3  ;;  %2061 = vset.pattern.permute.xlu0 %v2137_v7 }
   0x6   :  { %127 = vperm.xlu0 %2061, %v1619_v4   ;;  %2062 = vset.pattern.permute.xlu1 %v2137_v7 }
   0x7   :  { %1797 = vmatmul.mubr.msk.f32.gmra.mrb[2].mxu0 %vm22_vm0, %v20_v5  ;;  %137 = vperm.xlu1 %2062, %v1621_v6  }
   0x8   :  { %1808 = vmatprep.mubr.msk.f32.mxu1 %vm2136_vm1, %v2135_v2  ;;  %1823 = vmatprep.mubr.msk.f32.mxu0 %vm2136_vm1, %v2135_v2 }
   0xa   :  { %132 = vperm.xlu0 %2061, %v1620_v8  }
   0xb   :  { %9 = vsyncpa [#allocation3], 0  ;;  %v147_v10 = vld [vmem:[%s2501_s3 + $0x8] sm:$0xff]  ;;  %151 = vperm.xlu1 %2062, %v146_v9   ;;  %v148_v11 = vld [vmem:[%s2501_s3 + $0x10] sm:$0xff]  ;;  %v2138_v33 = vmov 0.0|0.0   ;;  %vm164_vm2 = vcmask 195584  }
   0xc   :  { %v1631_v12 = vld [vmem:[%s2501_s3 + $0x18] sm:$0xff]  ;;  %v1632_v13 = vld [vmem:[%s2501_s3 + $0x20] sm:$0xff]  ;;  %v1633_v14 = vld [vmem:[%s2501_s3 + $0x28] sm:$0xff]  ;;  %2012 = vmatprep.subr.bf16.mxu1 %v2138_v33  ;;  %2015 = vmatprep.subr.bf16.mxu0 %v2138_v33 }
   0xd   :  { %v1643_v15 = vld [vmem:[%s2501_s3 + $0x30] sm:$0xff]  ;;  %v1644_v16 = vld [vmem:[%s2501_s3 + $0x38] sm:$0xff]  ;;  %v1645_v17 = vld [vmem:[%s2501_s3 + $0x40] sm:$0xff] }
   0xe   :  { %156 = vperm.xlu0 %2061, %v147_v10   ;;  %v1655_v18 = vld [vmem:[%s2501_s3 + $0x48] sm:$0xff]  ;;  %v1656_v19 = vld [vmem:[%s2501_s3 + $0x50] sm:$0xff]  ;;  %v1657_v20 = vld [vmem:[%s2501_s3 + $0x58] sm:$0xff] }
   0xf   :  { %161 = vperm.xlu1 %2062, %v148_v11   ;;  %v1667_v21 = vld [vmem:[%s2501_s3 + $0x60] sm:$0xff]  ;;  %v1668_v22 = vld [vmem:[%s2501_s3 + $0x68] sm:$0xff]  ;;  %v1669_v23 = vld [vmem:[%s2501_s3 + $0x70] sm:$0xff] }
  0x10   :  { %v1679_v24 = vld [vmem:[%s2501_s3 + $0x78] sm:$0xff]  ;;  %v1680_v25 = vld [vmem:[%s2501_s3 + $0x80] sm:$0xff]  ;;  %v1681_v26 = vld [vmem:[%s2501_s3 + $0x88] sm:$0xff] }
  0x11   :  { %v1691_v27 = vld [vmem:[%s2501_s3 + $0x90] sm:$0xff]  ;;  %v1692_v28 = vld [vmem:[%s2501_s3 + $0x98] sm:$0xff]  ;;  %v1693_v29 = vld [vmem:[%s2501_s3 + $0xa0] sm:$0xff] }
  0x12   :  { %356 = vperm.xlu0 %2061, %v1631_v12   ;;  %v1700_v30 = vld [vmem:[%s2501_s3 + $0xc0] sm:$0xff]  ;;  %v1701_v31 = vld [vmem:[%s2501_s3 + $0xc8] sm:$0xff]  ;;  %v1702_v32 = vld [vmem:[%s2501_s3 + $0xd0] sm:$0xff] }
  0x13   :  { %361 = vperm.xlu1 %2062, %v1632_v13   ;;  %v143_v53 = vld [vmem:[%s2500_s2] sm:$0xff]  ;;  %v144_v58 = vld [vmem:[%s2500_s2 + $0x8] sm:$0xff]  ;;  %v145_v59 = vld [vmem:[%s2500_s2 + $0x10] sm:$0xff] }
  0x16   :  { %366 = vperm.xlu0 %2061, %v1633_v14  }
  0x17   :  { %560 = vperm.xlu1 %2062, %v1643_v15  }
  0x1a   :  { %565 = vperm.xlu0 %2061, %v1644_v16  }
  0x1b   :  { %570 = vperm.xlu1 %2062, %v1645_v17  }
  0x1e   :  { %764 = vperm.xlu0 %2061, %v1655_v18  }
  0x1f   :  { %769 = vperm.xlu1 %2062, %v1656_v19  }
  0x22   :  { %774 = vperm.xlu0 %2061, %v1657_v20  }
  0x23   :  { %968 = vperm.xlu1 %2062, %v1667_v21  }
  0x26   :  { %973 = vperm.xlu0 %2061, %v1668_v22  }
  0x27   :  { %978 = vperm.xlu1 %2062, %v1669_v23  }
  0x2a   :  { %1172 = vperm.xlu0 %2061, %v1679_v24  }
  0x2b   :  { %1177 = vperm.xlu1 %2062, %v1680_v25  }
  0x2e   :  { %1182 = vperm.xlu0 %2061, %v1681_v26   ;;  %v1628_v26 = vld [vmem:[%s2500_s2 + $0x18] sm:$0xff] }
  0x2f   :  { %1376 = vperm.xlu1 %2062, %v1691_v27  }
  0x32   :  { %1381 = vperm.xlu0 %2061, %v1692_v28  }
  0x33   :  { %1386 = vperm.xlu1 %2062, %v1693_v29  }
  0x36   :  { %1576 = vperm.xlu0 %2061, %v1700_v30   ;;  %v1629_v30 = vld [vmem:[%s2500_s2 + $0x20] sm:$0xff] }
  0x37   :  { %1581 = vperm.xlu1 %2062, %v1701_v31   ;;  %v1630_v31 = vld [vmem:[%s2500_s2 + $0x28] sm:$0xff] }
  0x3a   :  { %1586 = vperm.xlu0 %2061, %v1702_v32  }
  0x85   :  { %v128_v41 = vpop.permute.xlu0 %127 }
  0x86   :  { %v138_v55 = vpop.permute.xlu1 %137 }
  0x89   :  { %v133_v49 = vpop.permute.xlu0 %132 }
  0x8a   :  { %v152_v60 = vpop.permute.xlu1 %151 }
  0x8d   :  { %v157_v0 = vpop.permute.xlu0 %156 }
  0x8e   :  { %v162_v7 = vpop.permute.xlu1 %161 }
  0x91   :  { %v357_v32 = vpop.permute.xlu0 %356 }
  0xd6   :  { %v98_v34 = vpop.f32.mrb[0].mxu0 }
  0xd7   :  { %2063 = vtanh.f32 %v98_v34  ;;  %v1795_v35 = vpop.f32.mrb[1].mxu0 }
  0xd8   :  { %v108_v36 = vpop.f32.mrb[0].mxu1 }
  0xd9   :  { %2065 = vtanh.f32 %v108_v36  ;;  %v1801_v37 = vpop.f32.mrb[1].mxu1 }
  0xda   :  { %v103_v38 = vpop.f32.mrb[2].mxu0  ;;  %v362_v37 = vpop.permute.xlu1 %361 }
  0xdb   :  { %2067 = vtanh.f32 %v103_v38  ;;  %v1798_v39 = vpop.f32.mrb[3].mxu0 }
  0xe1   :  { %v2064_v40 = vpop.eup %2063 }
  0xe2   :  { %v119_v42 = vmul.f32 %v2064_v40, %v2064_v40 }
  0xe3   :  { %v2066_v43 = vpop.eup %2065 }
  0xe4   :  { %v122_v45 = vsub.f32 1.0, %v119_v42  ;;  %v121_v48 = vmul.f32 %v2066_v43, %v2066_v43 }
  0xe5   :  { %v2068_v44 = vpop.eup %2067 }
  0xe6   :  { %v2013_v46 = vpack.c.bf16 %v2068_v44, %v2064_v40  ;;  %v120_v47 = vmul.f32 %v2068_v44, %v2068_v44  ;;  %v140_v51 = vmul.f32 %v128_v41, %v122_v45  ;;  %v124_v54 = vsub.f32 1.0, %v121_v48 }
  0xe8   :  { %2014 = vmatpush3.bf16.msra.mxu1 %v2013_v46  ;;  %v123_v50 = vsub.f32 1.0, %v120_v47  ;;  %v142_v57 = vmul.f32 %v138_v55, %v124_v54 }
  0xe9   :  { %1806 = vmatprep.subr.mxu1 %v2135_v2 }
  0xea   :  { %v141_v52 = vmul.f32 %v133_v49, %v123_v50 }
  0xec   :  { %v2016_v56 = vpack.c.bf16 %v141_v52, %v140_v51  ;;  %1807 = vmatpush3.msra.mxu1 %v2066_v43  ;;  %v367_v43 = vpop.permute.xlu0 %366 }
  0xed   :  { %1809 = vmatmul.mubr.msk.f32.vlgmr.msra.gmra.mrb[2].mxu1 %vm164_vm2, %v143_v53  ;;  %2018 = vmatprep.subr.bf16.mxu1 %v2138_v33 }
  0xee   :  { %2017 = vmatpush3.bf16.msra.mxu0 %v2016_v56  ;;  %1811 = vmatprep.mubr.msk.f32.mxu1 %vm2136_vm1, %v2135_v2 }
  0xef   :  { %1821 = vmatprep.subr.mxu0 %v2135_v2 }
  0xf1   :  { %1812 = vmatmul.mubr.msk.f32.gmra.mrb[4].mxu1 %vm164_vm2, %v144_v58 }
  0xf2   :  { %1822 = vmatpush3.msra.mxu0 %v142_v57  ;;  %1814 = vmatprep.mubr.msk.f32.mxu1 %vm2136_vm1, %v2135_v2 }
  0xf3   :  { %1824 = vmatmul.mubr.msk.f32.vlgmr.msra.gmra.mrb[4].mxu0 %vm164_vm2, %v143_v53  ;;  %2021 = vmatprep.subr.bf16.mxu0 %v2138_v33 }
  0xf4   :  { %1826 = vmatprep.mubr.msk.f32.mxu0 %vm2136_vm1, %v2135_v2 }
  0xf5   :  { %1815 = vmatmul.mubr.msk.f32.gmra.mrb[6].mxu1 %vm164_vm2, %v145_v59 }
  0xf6   :  { %1838 = vmatprep.mubr.msk.f32.mxu1 %vm2136_vm1, %v2135_v2 }
  0xf7   :  { %1827 = vmatmul.mubr.msk.f32.gmra.mrb[6].mxu0 %vm164_vm2, %v144_v58 }
  0xf8   :  { %1829 = vmatprep.mubr.msk.f32.mxu0 %vm2136_vm1, %v2135_v2 }
  0xfb   :  { %1830 = vmatmul.mubr.msk.f32.gmra.mrb[8].mxu0 %vm164_vm2, %v145_v59 }
  0xfc   :  { %1853 = vmatprep.mubr.msk.f32.mxu0 %vm2136_vm1, %v2135_v2 }
 0x1c0   :  { %v240_v61 = vpop.f32.mrb[2].mxu1 }
 0x1c1   :  { %v241_v62 = vadd.f32 %v240_v61, %v152_v60  ;;  %v1810_v63 = vpop.f32.mrb[3].mxu1 }
 0x1c3   :  { %2069 = vtanh.f32 %v241_v62  ;;  %v1640_v62 = vld [vmem:[%s2500_s2 + $0x30] sm:$0xff] }
 0x1c4   :  { %v245_v1 = vpop.f32.mrb[4].mxu1 }
 0x1c5   :  { %v246_v3 = vadd.f32 %v245_v1, %v157_v0  ;;  %v1813_v4 = vpop.f32.mrb[5].mxu1 }
 0x1c6   :  { %v320_v5 = vpop.f32.mrb[4].mxu0  ;;  %v1642_v4 = vld [vmem:[%s2500_s2 + $0x40] sm:$0xff] }
 0x1c7   :  { %2071 = vtanh.f32 %v246_v3  ;;  %v1825_v6 = vpop.f32.mrb[5].mxu0  ;;  %v1641_v3 = vld [vmem:[%s2500_s2 + $0x38] sm:$0xff] }
 0x1c8   :  { %v250_v8 = vpop.f32.mrb[6].mxu1 }
 0x1c9   :  { %v251_v9 = vadd.f32 %v250_v8, %v162_v7  ;;  %v1816_v10 = vpop.f32.mrb[7].mxu1 }
 0x1ca   :  { %v325_v11 = vpop.f32.mrb[6].mxu0 }
 0x1cb   :  { %2073 = vtanh.f32 %v251_v9  ;;  %v1828_v12 = vpop.f32.mrb[7].mxu0  ;;  %v566_v9 = vpop.permute.xlu0 %565 }
 0x1cd   :  { %v2070_v13 = vpop.eup %2069 }
 0x1ce   :  { %v337_v14 = vmul.f32 %v2070_v13, %v2070_v13  ;;  %v330_v15 = vpop.f32.mrb[8].mxu0 }
 0x1cf   :  { %v1831_v16 = vpop.f32.mrb[9].mxu0 }
 0x1d0   :  { %v340_v17 = vsub.f32 1.0, %v337_v14 }
 0x1d1   :  { %v2072_v18 = vpop.eup %2071 }
 0x1d2   :  { %v343_v19 = vmul.f32 %v340_v17, %v320_v5  ;;  %v2019_v20 = vpack.c.bf16 %v2072_v18, %v2070_v13  ;;  %v338_v21 = vmul.f32 %v2072_v18, %v2072_v18  ;;  %v561_v5 = vpop.permute.xlu1 %560 }
 0x1d4   :  { %2020 = vmatpush3.bf16.msra.mxu1 %v2019_v20  ;;  %v341_v22 = vsub.f32 1.0, %v338_v21 }
 0x1d5   :  { %v2074_v23 = vpop.eup %2073  ;;  %1836 = vmatprep.subr.mxu1 %v2135_v2 }
 0x1d6   :  { %v344_v24 = vmul.f32 %v341_v22, %v325_v11  ;;  %v339_v25 = vmul.f32 %v2074_v23, %v2074_v23 }
 0x1d8   :  { %v2022_v27 = vpack.c.bf16 %v344_v24, %v343_v19  ;;  %1837 = vmatpush3.msra.mxu1 %v2074_v23  ;;  %v342_v28 = vsub.f32 1.0, %v339_v25 }
 0x1d9   :  { %1839 = vmatmul.mubr.msk.f32.vlgmr.msra.gmra.mrb[8].mxu1 %vm164_vm2, %v1628_v26  ;;  %2024 = vmatprep.subr.bf16.mxu1 %v2138_v33 }
 0x1da   :  { %v345_v29 = vmul.f32 %v342_v28, %v330_v15  ;;  %2023 = vmatpush3.bf16.msra.mxu0 %v2022_v27  ;;  %1841 = vmatprep.mubr.msk.f32.mxu1 %vm2136_vm1, %v2135_v2  ;;  %v571_v15 = vpop.permute.xlu1 %570 }
 0x1db   :  { %1851 = vmatprep.subr.mxu0 %v2135_v2 }
 0x1dd   :  { %1842 = vmatmul.mubr.msk.f32.gmra.mrb[10].mxu1 %vm164_vm2, %v1629_v30 }
 0x1de   :  { %1852 = vmatpush3.msra.mxu0 %v345_v29  ;;  %1844 = vmatprep.mubr.msk.f32.mxu1 %vm2136_vm1, %v2135_v2 }
 0x1df   :  { %1854 = vmatmul.mubr.msk.f32.vlgmr.msra.gmra.mrb[10].mxu0 %vm164_vm2, %v1628_v26  ;;  %2027 = vmatprep.subr.bf16.mxu0 %v2138_v33 }
 0x1e0   :  { %1856 = vmatprep.mubr.msk.f32.mxu0 %vm2136_vm1, %v2135_v2 }
 0x1e1   :  { %1845 = vmatmul.mubr.msk.f32.gmra.mrb[12].mxu1 %vm164_vm2, %v1630_v31 }
 0x1e2   :  { %1868 = vmatprep.mubr.msk.f32.mxu1 %vm2136_vm1, %v2135_v2 }
 0x1e3   :  { %1857 = vmatmul.mubr.msk.f32.gmra.mrb[12].mxu0 %vm164_vm2, %v1629_v30 }
 0x1e4   :  { %1859 = vmatprep.mubr.msk.f32.mxu0 %vm2136_vm1, %v2135_v2 }
 0x1e7   :  { %1860 = vmatmul.mubr.msk.f32.gmra.mrb[14].mxu0 %vm164_vm2, %v1630_v31 }
 0x1e8   :  { %1883 = vmatprep.mubr.msk.f32.mxu0 %vm2136_vm1, %v2135_v2 }
 0x2ac   :  { %v444_v34 = vpop.f32.mrb[8].mxu1 }
 0x2ad   :  { %v445_v35 = vadd.f32 %v444_v34, %v357_v32  ;;  %v1840_v36 = vpop.f32.mrb[9].mxu1 }
 0x2af   :  { %2075 = vtanh.f32 %v445_v35  ;;  %v1652_v35 = vld [vmem:[%s2500_s2 + $0x48] sm:$0xff] }
 0x2b0   :  { %v449_v38 = vpop.f32.mrb[10].mxu1 }
 0x2b1   :  { %v450_v39 = vadd.f32 %v449_v38, %v362_v37  ;;  %v1843_v40 = vpop.f32.mrb[11].mxu1 }
 0x2b2   :  { %v524_v41 = vpop.f32.mrb[10].mxu0  ;;  %v1654_v40 = vld [vmem:[%s2500_s2 + $0x58] sm:$0xff] }
 0x2b3   :  { %2077 = vtanh.f32 %v450_v39  ;;  %v1855_v42 = vpop.f32.mrb[11].mxu0  ;;  %v1653_v39 = vld [vmem:[%s2500_s2 + $0x50] sm:$0xff] }
 0x2b4   :  { %v454_v44 = vpop.f32.mrb[12].mxu1 }
 0x2b5   :  { %v455_v45 = vadd.f32 %v454_v44, %v367_v43  ;;  %v1846_v46 = vpop.f32.mrb[13].mxu1 }
 0x2b6   :  { %v529_v47 = vpop.f32.mrb[12].mxu0 }
 0x2b7   :  { %2079 = vtanh.f32 %v455_v45  ;;  %v1858_v48 = vpop.f32.mrb[13].mxu0  ;;  %v770_v45 = vpop.permute.xlu1 %769 }
 0x2b9   :  { %v2076_v49 = vpop.eup %2075 }
 0x2ba   :  { %v541_v50 = vmul.f32 %v2076_v49, %v2076_v49  ;;  %v534_v51 = vpop.f32.mrb[14].mxu0 }
 0x2bb   :  { %v1861_v52 = vpop.f32.mrb[15].mxu0 }
 0x2bc   :  { %v544_v53 = vsub.f32 1.0, %v541_v50 }
 0x2bd   :  { %v2078_v54 = vpop.eup %2077 }
 0x2be   :  { %v547_v55 = vmul.f32 %v544_v53, %v524_v41  ;;  %v2025_v56 = vpack.c.bf16 %v2078_v54, %v2076_v49  ;;  %v542_v57 = vmul.f32 %v2078_v54, %v2078_v54  ;;  %v765_v41 = vpop.permute.xlu0 %764 }
 0x2c0   :  { %2026 = vmatpush3.bf16.msra.mxu1 %v2025_v56  ;;  %v545_v58 = vsub.f32 1.0, %v542_v57 }
 0x2c1   :  { %v2080_v59 = vpop.eup %2079  ;;  %1866 = vmatprep.subr.mxu1 %v2135_v2 }
 0x2c2   :  { %v548_v60 = vmul.f32 %v545_v58, %v529_v47  ;;  %v543_v61 = vmul.f32 %v2080_v59, %v2080_v59 }
 0x2c4   :  { %v2028_v63 = vpack.c.bf16 %v548_v60, %v547_v55  ;;  %1867 = vmatpush3.msra.mxu1 %v2080_v59  ;;  %v546_v0 = vsub.f32 1.0, %v543_v61 }
 0x2c5   :  { %1869 = vmatmul.mubr.msk.f32.vlgmr.msra.gmra.mrb[14].mxu1 %vm164_vm2, %v1640_v62  ;;  %2030 = vmatprep.subr.bf16.mxu1 %v2138_v33 }
 0x2c6   :  { %v549_v1 = vmul.f32 %v546_v0, %v534_v51  ;;  %2029 = vmatpush3.bf16.msra.mxu0 %v2028_v63  ;;  %1871 = vmatprep.mubr.msk.f32.mxu1 %vm2136_vm1, %v2135_v2  ;;  %v775_v51 = vpop.permute.xlu0 %774 }
 0x2c7   :  { %1881 = vmatprep.subr.mxu0 %v2135_v2 }
 0x2c9   :  { %1872 = vmatmul.mubr.msk.f32.gmra.mrb[16].mxu1 %vm164_vm2, %v1641_v3 }
 0x2ca   :  { %1882 = vmatpush3.msra.mxu0 %v549_v1  ;;  %1874 = vmatprep.mubr.msk.f32.mxu1 %vm2136_vm1, %v2135_v2 }
 0x2cb   :  { %1884 = vmatmul.mubr.msk.f32.vlgmr.msra.gmra.mrb[16].mxu0 %vm164_vm2, %v1640_v62  ;;  %2033 = vmatprep.subr.bf16.mxu0 %v2138_v33 }
 0x2cc   :  { %1886 = vmatprep.mubr.msk.f32.mxu0 %vm2136_vm1, %v2135_v2 }
 0x2cd   :  { %1875 = vmatmul.mubr.msk.f32.gmra.mrb[18].mxu1 %vm164_vm2, %v1642_v4 }
 0x2ce   :  { %1898 = vmatprep.mubr.msk.f32.mxu1 %vm2136_vm1, %v2135_v2 }
 0x2cf   :  { %1887 = vmatmul.mubr.msk.f32.gmra.mrb[18].mxu0 %vm164_vm2, %v1641_v3 }
 0x2d0   :  { %1889 = vmatprep.mubr.msk.f32.mxu0 %vm2136_vm1, %v2135_v2 }
 0x2d3   :  { %1890 = vmatmul.mubr.msk.f32.gmra.mrb[20].mxu0 %vm164_vm2, %v1642_v4 }
 0x2d4   :  { %1913 = vmatprep.mubr.msk.f32.mxu0 %vm2136_vm1, %v2135_v2 }
 0x398   :  { %v648_v6 = vpop.f32.mrb[14].mxu1 }
 0x399   :  { %v649_v7 = vadd.f32 %v648_v6, %v561_v5  ;;  %v1870_v8 = vpop.f32.mrb[15].mxu1 }
 0x39b   :  { %2081 = vtanh.f32 %v649_v7  ;;  %v1664_v7 = vld [vmem:[%s2500_s2 + $0x60] sm:$0xff] }
 0x39c   :  { %v653_v10 = vpop.f32.mrb[16].mxu1 }
 0x39d   :  { %v654_v11 = vadd.f32 %v653_v10, %v566_v9  ;;  %v1873_v12 = vpop.f32.mrb[17].mxu1 }
 0x39e   :  { %v728_v13 = vpop.f32.mrb[16].mxu0  ;;  %v1666_v12 = vld [vmem:[%s2500_s2 + $0x70] sm:$0xff] }
 0x39f   :  { %2083 = vtanh.f32 %v654_v11  ;;  %v1885_v14 = vpop.f32.mrb[17].mxu0  ;;  %v1665_v11 = vld [vmem:[%s2500_s2 + $0x68] sm:$0xff] }
 0x3a0   :  { %v658_v16 = vpop.f32.mrb[18].mxu1 }
 0x3a1   :  { %v659_v17 = vadd.f32 %v658_v16, %v571_v15  ;;  %v1876_v18 = vpop.f32.mrb[19].mxu1 }
 0x3a2   :  { %v733_v19 = vpop.f32.mrb[18].mxu0 }
 0x3a3   :  { %2085 = vtanh.f32 %v659_v17  ;;  %v1888_v20 = vpop.f32.mrb[19].mxu0  ;;  %v974_v17 = vpop.permute.xlu0 %973 }
 0x3a5   :  { %v2082_v21 = vpop.eup %2081 }
 0x3a6   :  { %v745_v22 = vmul.f32 %v2082_v21, %v2082_v21  ;;  %v738_v23 = vpop.f32.mrb[20].mxu0 }
 0x3a7   :  { %v1891_v24 = vpop.f32.mrb[21].mxu0 }
 0x3a8   :  { %v748_v25 = vsub.f32 1.0, %v745_v22 }
 0x3a9   :  { %v2084_v26 = vpop.eup %2083 }
 0x3aa   :  { %v751_v27 = vmul.f32 %v748_v25, %v728_v13  ;;  %v2031_v28 = vpack.c.bf16 %v2084_v26, %v2082_v21  ;;  %v746_v29 = vmul.f32 %v2084_v26, %v2084_v26  ;;  %v969_v13 = vpop.permute.xlu1 %968 }
 0x3ac   :  { %2032 = vmatpush3.bf16.msra.mxu1 %v2031_v28  ;;  %v749_v30 = vsub.f32 1.0, %v746_v29 }
 0x3ad   :  { %v2086_v31 = vpop.eup %2085  ;;  %1896 = vmatprep.subr.mxu1 %v2135_v2 }
 0x3ae   :  { %v752_v32 = vmul.f32 %v749_v30, %v733_v19  ;;  %v747_v34 = vmul.f32 %v2086_v31, %v2086_v31 }
 0x3b0   :  { %v2034_v36 = vpack.c.bf16 %v752_v32, %v751_v27  ;;  %1897 = vmatpush3.msra.mxu1 %v2086_v31  ;;  %v750_v37 = vsub.f32 1.0, %v747_v34 }
 0x3b1   :  { %1899 = vmatmul.mubr.msk.f32.vlgmr.msra.gmra.mrb[20].mxu1 %vm164_vm2, %v1652_v35  ;;  %2036 = vmatprep.subr.bf16.mxu1 %v2138_v33 }
 0x3b2   :  { %v753_v38 = vmul.f32 %v750_v37, %v738_v23  ;;  %2035 = vmatpush3.bf16.msra.mxu0 %v2034_v36  ;;  %1901 = vmatprep.mubr.msk.f32.mxu1 %vm2136_vm1, %v2135_v2  ;;  %v979_v23 = vpop.permute.xlu1 %978 }
 0x3b3   :  { %1911 = vmatprep.subr.mxu0 %v2135_v2 }
 0x3b5   :  { %1902 = vmatmul.mubr.msk.f32.gmra.mrb[22].mxu1 %vm164_vm2, %v1653_v39 }
 0x3b6   :  { %1912 = vmatpush3.msra.mxu0 %v753_v38  ;;  %1904 = vmatprep.mubr.msk.f32.mxu1 %vm2136_vm1, %v2135_v2 }
 0x3b7   :  { %1914 = vmatmul.mubr.msk.f32.vlgmr.msra.gmra.mrb[22].mxu0 %vm164_vm2, %v1652_v35  ;;  %2039 = vmatprep.subr.bf16.mxu0 %v2138_v33 }
 0x3b8   :  { %1916 = vmatprep.mubr.msk.f32.mxu0 %vm2136_vm1, %v2135_v2 }
 0x3b9   :  { %1905 = vmatmul.mubr.msk.f32.gmra.mrb[24].mxu1 %vm164_vm2, %v1654_v40 }
 0x3ba   :  { %1928 = vmatprep.mubr.msk.f32.mxu1 %vm2136_vm1, %v2135_v2 }
 0x3bb   :  { %1917 = vmatmul.mubr.msk.f32.gmra.mrb[24].mxu0 %vm164_vm2, %v1653_v39 }
 0x3bc   :  { %1919 = vmatprep.mubr.msk.f32.mxu0 %vm2136_vm1, %v2135_v2 }
 0x3bf   :  { %1920 = vmatmul.mubr.msk.f32.gmra.mrb[26].mxu0 %vm164_vm2, %v1654_v40 }
 0x3c0   :  { %1943 = vmatprep.mubr.msk.f32.mxu0 %vm2136_vm1, %v2135_v2 }
 0x484   :  { %v852_v42 = vpop.f32.mrb[20].mxu1 }
 0x485   :  { %v853_v43 = vadd.f32 %v852_v42, %v765_v41  ;;  %v1900_v44 = vpop.f32.mrb[21].mxu1 }
 0x487   :  { %2087 = vtanh.f32 %v853_v43  ;;  %v1676_v43 = vld [vmem:[%s2500_s2 + $0x78] sm:$0xff] }
 0x488   :  { %v857_v46 = vpop.f32.mrb[22].mxu1 }
 0x489   :  { %v858_v47 = vadd.f32 %v857_v46, %v770_v45  ;;  %v1903_v48 = vpop.f32.mrb[23].mxu1 }
 0x48a   :  { %v932_v49 = vpop.f32.mrb[22].mxu0  ;;  %v1678_v48 = vld [vmem:[%s2500_s2 + $0x88] sm:$0xff] }
 0x48b   :  { %2089 = vtanh.f32 %v858_v47  ;;  %v1915_v50 = vpop.f32.mrb[23].mxu0  ;;  %v1677_v47 = vld [vmem:[%s2500_s2 + $0x80] sm:$0xff] }
 0x48c   :  { %v862_v52 = vpop.f32.mrb[24].mxu1 }
 0x48d   :  { %v863_v53 = vadd.f32 %v862_v52, %v775_v51  ;;  %v1906_v54 = vpop.f32.mrb[25].mxu1  ;;  %v1178_v52 = vpop.permute.xlu1 %1177 }
 0x48e   :  { %v937_v55 = vpop.f32.mrb[24].mxu0 }
 0x48f   :  { %2091 = vtanh.f32 %v863_v53  ;;  %v1918_v56 = vpop.f32.mrb[25].mxu0 }
 0x491   :  { %v2088_v57 = vpop.eup %2087 }
 0x492   :  { %v949_v58 = vmul.f32 %v2088_v57, %v2088_v57  ;;  %v942_v59 = vpop.f32.mrb[26].mxu0 }
 0x493   :  { %v1921_v60 = vpop.f32.mrb[27].mxu0 }
 0x494   :  { %v952_v61 = vsub.f32 1.0, %v949_v58 }
 0x495   :  { %v2090_v62 = vpop.eup %2089 }
 0x496   :  { %v955_v63 = vmul.f32 %v952_v61, %v932_v49  ;;  %v2037_v0 = vpack.c.bf16 %v2090_v62, %v2088_v57  ;;  %v950_v1 = vmul.f32 %v2090_v62, %v2090_v62  ;;  %v1173_v49 = vpop.permute.xlu0 %1172 }
 0x498   :  { %2038 = vmatpush3.bf16.msra.mxu1 %v2037_v0  ;;  %v953_v3 = vsub.f32 1.0, %v950_v1 }
 0x499   :  { %v2092_v4 = vpop.eup %2091  ;;  %1926 = vmatprep.subr.mxu1 %v2135_v2 }
 0x49a   :  { %v956_v5 = vmul.f32 %v953_v3, %v937_v55  ;;  %v951_v6 = vmul.f32 %v2092_v4, %v2092_v4  ;;  %v1183_v58 = vpop.permute.xlu0 %1182 }
 0x49c   :  { %v2040_v8 = vpack.c.bf16 %v956_v5, %v955_v63  ;;  %1927 = vmatpush3.msra.mxu1 %v2092_v4  ;;  %v954_v9 = vsub.f32 1.0, %v951_v6 }
 0x49d   :  { %1929 = vmatmul.mubr.msk.f32.vlgmr.msra.gmra.mrb[26].mxu1 %vm164_vm2, %v1664_v7  ;;  %2042 = vmatprep.subr.bf16.mxu1 %v2138_v33 }
 0x49e   :  { %v957_v10 = vmul.f32 %v954_v9, %v942_v59  ;;  %2041 = vmatpush3.bf16.msra.mxu0 %v2040_v8  ;;  %1931 = vmatprep.mubr.msk.f32.mxu1 %vm2136_vm1, %v2135_v2 }
 0x49f   :  { %1941 = vmatprep.subr.mxu0 %v2135_v2 }
 0x4a1   :  { %1932 = vmatmul.mubr.msk.f32.gmra.mrb[28].mxu1 %vm164_vm2, %v1665_v11 }
 0x4a2   :  { %1942 = vmatpush3.msra.mxu0 %v957_v10  ;;  %1934 = vmatprep.mubr.msk.f32.mxu1 %vm2136_vm1, %v2135_v2 }
 0x4a3   :  { %1944 = vmatmul.mubr.msk.f32.vlgmr.msra.gmra.mrb[28].mxu0 %vm164_vm2, %v1664_v7  ;;  %2045 = vmatprep.subr.bf16.mxu0 %v2138_v33 }
 0x4a4   :  { %1946 = vmatprep.mubr.msk.f32.mxu0 %vm2136_vm1, %v2135_v2 }
 0x4a5   :  { %1935 = vmatmul.mubr.msk.f32.gmra.mrb[30].mxu1 %vm164_vm2, %v1666_v12 }
 0x4a6   :  { %1958 = vmatprep.mubr.msk.f32.mxu1 %vm2136_vm1, %v2135_v2 }
 0x4a7   :  { %1947 = vmatmul.mubr.msk.f32.gmra.mrb[30].mxu0 %vm164_vm2, %v1665_v11 }
 0x4a8   :  { %1949 = vmatprep.mubr.msk.f32.mxu0 %vm2136_vm1, %v2135_v2 }
 0x4ab   :  { %1950 = vmatmul.mubr.msk.f32.gmra.mrb[32].mxu0 %vm164_vm2, %v1666_v12 }
 0x4ac   :  { %1973 = vmatprep.mubr.msk.f32.mxu0 %vm2136_vm1, %v2135_v2 }
 0x570   :  { %v1056_v14 = vpop.f32.mrb[26].mxu1 }
 0x571   :  { %v1057_v15 = vadd.f32 %v1056_v14, %v969_v13  ;;  %v1930_v16 = vpop.f32.mrb[27].mxu1  ;;  %v1688_v14 = vld [vmem:[%s2500_s2 + $0x90] sm:$0xff] }
 0x573   :  { %2093 = vtanh.f32 %v1057_v15 }
 0x574   :  { %v1061_v18 = vpop.f32.mrb[28].mxu1 }
 0x575   :  { %v1062_v19 = vadd.f32 %v1061_v18, %v974_v17  ;;  %v1933_v20 = vpop.f32.mrb[29].mxu1  ;;  %v1689_v18 = vld [vmem:[%s2500_s2 + $0x98] sm:$0xff] }
 0x576   :  { %v1136_v21 = vpop.f32.mrb[28].mxu0  ;;  %v1377_v20 = vpop.permute.xlu1 %1376 }
 0x577   :  { %2095 = vtanh.f32 %v1062_v19  ;;  %v1945_v22 = vpop.f32.mrb[29].mxu0  ;;  %v1690_v19 = vld [vmem:[%s2500_s2 + $0xa0] sm:$0xff]  ;;  %s2139_s2 = smov [#allocation2]  }
 0x578   :  { %v1066_v24 = vpop.f32.mrb[30].mxu1  ;;  %s1608_s5 = sshll.u32 %s2139_s2, 4  ;;  %s1609_s5 = int_to_ptr.vmem [resolvable:$true] %s1608_s5 }
 0x579   :  { %v1067_v25 = vadd.f32 %v1066_v24, %v979_v23  ;;  %v1936_v26 = vpop.f32.mrb[31].mxu1  ;;  %v1382_v24 = vpop.permute.xlu0 %1381  ;;  %s2111_s6 = scalar_lea.vmem %s1609_s5, 16  ;;  %s2115_s7 = scalar_lea.vmem %s1609_s5, 32 }
 0x57a   :  { %v1141_v27 = vpop.f32.mrb[30].mxu0  ;;  %p2112_p0 = scmp.ne.s32.totalorder %s1609_s5, %s2111_s6  ;;  %p2116_p1 = scmp.lt.s32.totalorder %s1609_s5, %s1609_s5 }
 0x57b   :  { %2097 = vtanh.f32 %v1067_v25  ;;  %v1948_v28 = vpop.f32.mrb[31].mxu0  ;;  %p2117_p2 = scmp.lt.s32.totalorder %s2115_s7, %s2111_s6 }
 0x57d   :  { %v2094_v29 = vpop.eup %2093  ;;  %p2118_p3 = por %p2117_p2, %p2116_p1 }
 0x57e   :  { %v1153_v30 = vmul.f32 %v2094_v29, %v2094_v29  ;;  %v1146_v31 = vpop.f32.mrb[32].mxu0 }
 0x57f   :  { %v1951_v32 = vpop.f32.mrb[33].mxu0  ;;  %p2119_p4 = pnand %p2118_p3, %p2112_p0 }
 0x580   :  { %v1156_v34 = vsub.f32 1.0, %v1153_v30  ;;  %v1387_v30 = vpop.permute.xlu1 %1386 }
 0x581   :  { %v2096_v35 = vpop.eup %2095 }
 0x582   :  { %v1159_v36 = vmul.f32 %v1156_v34, %v1136_v21  ;;  %v2043_v37 = vpack.c.bf16 %v2096_v35, %v2094_v29  ;;  %v1154_v38 = vmul.f32 %v2096_v35, %v2096_v35 }
 0x584   :  { %2044 = vmatpush3.bf16.msra.mxu1 %v2043_v37  ;;  %v1157_v39 = vsub.f32 1.0, %v1154_v38 }
 0x585   :  { %v2098_v40 = vpop.eup %2097  ;;  %1956 = vmatprep.subr.mxu1 %v2135_v2 }
 0x586   :  { %v1160_v41 = vmul.f32 %v1157_v39, %v1141_v27  ;;  %v1155_v42 = vmul.f32 %v2098_v40, %v2098_v40 }
 0x588   :  { %v2046_v44 = vpack.c.bf16 %v1160_v41, %v1159_v36  ;;  %1957 = vmatpush3.msra.mxu1 %v2098_v40  ;;  %v1158_v45 = vsub.f32 1.0, %v1155_v42 }
 0x589   :  { %1959 = vmatmul.mubr.msk.f32.vlgmr.msra.gmra.mrb[32].mxu1 %vm164_vm2, %v1676_v43  ;;  %2048 = vmatprep.subr.bf16.mxu1 %v2138_v33 }
 0x58a   :  { %v1161_v46 = vmul.f32 %v1158_v45, %v1146_v31  ;;  %2047 = vmatpush3.bf16.msra.mxu0 %v2046_v44  ;;  %1961 = vmatprep.mubr.msk.f32.mxu1 %vm2136_vm1, %v2135_v2 }
 0x58b   :  { %1971 = vmatprep.subr.mxu0 %v2135_v2 }
 0x58d   :  { %1962 = vmatmul.mubr.msk.f32.gmra.mrb[34].mxu1 %vm164_vm2, %v1677_v47 }
 0x58e   :  { %1972 = vmatpush3.msra.mxu0 %v1161_v46  ;;  %1964 = vmatprep.mubr.msk.f32.mxu1 %vm2136_vm1, %v2135_v2  ;;  %v1577_v46 = vpop.permute.xlu0 %1576 }
 0x58f   :  { %1974 = vmatmul.mubr.msk.f32.vlgmr.msra.gmra.mrb[34].mxu0 %vm164_vm2, %v1676_v43  ;;  %2051 = vmatprep.subr.bf16.mxu0 %v2138_v33 }
 0x590   :  { %1976 = vmatprep.mubr.msk.f32.mxu0 %vm2136_vm1, %v2135_v2 }
 0x591   :  { %1965 = vmatmul.mubr.msk.f32.gmra.mrb[36].mxu1 %vm164_vm2, %v1678_v48 }
 0x592   :  { %1988 = vmatprep.mubr.msk.f32.mxu1 %vm2136_vm1, %v2135_v2 }
 0x593   :  { %1977 = vmatmul.mubr.msk.f32.gmra.mrb[36].mxu0 %vm164_vm2, %v1677_v47 }
 0x594   :  { %1979 = vmatprep.mubr.msk.f32.mxu0 %vm2136_vm1, %v2135_v2 }
 0x597   :  { %1980 = vmatmul.mubr.msk.f32.gmra.mrb[38].mxu0 %vm164_vm2, %v1678_v48 }
 0x598   :  { %2003 = vmatprep.mubr.msk.f32.mxu0 %vm2136_vm1, %v2135_v2 }
 0x65c   :  { %v1260_v33 = vpop.f32.mrb[32].mxu1 }
 0x65d   :  { %v1261_v50 = vadd.f32 %v1260_v33, %v1173_v49  ;;  %v1960_v51 = vpop.f32.mrb[33].mxu1  ;;  %v1582_v49 = vpop.permute.xlu1 %1581 }
 0x65f   :  { %2099 = vtanh.f32 %v1261_v50 }
 0x660   :  { %v1265_v53 = vpop.f32.mrb[34].mxu1 }
 0x661   :  { %v1266_v54 = vadd.f32 %v1265_v53, %v1178_v52  ;;  %v1963_v55 = vpop.f32.mrb[35].mxu1 }
 0x662   :  { %v1340_v56 = vpop.f32.mrb[34].mxu0 }
 0x663   :  { %2101 = vtanh.f32 %v1266_v54  ;;  %v1975_v57 = vpop.f32.mrb[35].mxu0  ;;  %v1587_v54 = vpop.permute.xlu0 %1586 }
 0x664   :  { %v1270_v59 = vpop.f32.mrb[36].mxu1 }
 0x665   :  { %v1271_v60 = vadd.f32 %v1270_v59, %v1183_v58  ;;  %v1966_v61 = vpop.f32.mrb[37].mxu1 }
 0x666   :  { %v1345_v62 = vpop.f32.mrb[36].mxu0 }
 0x667   :  { %2103 = vtanh.f32 %v1271_v60  ;;  %v1978_v63 = vpop.f32.mrb[37].mxu0 }
 0x669   :  { %v2100_v0 = vpop.eup %2099 }
 0x66a   :  { %v1357_v1 = vmul.f32 %v2100_v0, %v2100_v0  ;;  %v1350_v3 = vpop.f32.mrb[38].mxu0 }
 0x66b   :  { %v1981_v4 = vpop.f32.mrb[39].mxu0 }
 0x66c   :  { %v1360_v5 = vsub.f32 1.0, %v1357_v1 }
 0x66d   :  { %v2102_v6 = vpop.eup %2101 }
 0x66e   :  { %v1363_v7 = vmul.f32 %v1360_v5, %v1340_v56  ;;  %v2049_v8 = vpack.c.bf16 %v2102_v6, %v2100_v0  ;;  %v1358_v9 = vmul.f32 %v2102_v6, %v2102_v6 }
 0x670   :  { %2050 = vmatpush3.bf16.msra.mxu1 %v2049_v8  ;;  %v1361_v10 = vsub.f32 1.0, %v1358_v9 }
 0x671   :  { %v2104_v11 = vpop.eup %2103  ;;  %1986 = vmatprep.subr.mxu1 %v2135_v2 }
 0x672   :  { %v1364_v12 = vmul.f32 %v1361_v10, %v1345_v62  ;;  %v1359_v13 = vmul.f32 %v2104_v11, %v2104_v11 }
 0x674   :  { %v2052_v15 = vpack.c.bf16 %v1364_v12, %v1363_v7  ;;  %1987 = vmatpush3.msra.mxu1 %v2104_v11  ;;  %v1362_v16 = vsub.f32 1.0, %v1359_v13 }
 0x675   :  { %1989 = vmatmul.mubr.msk.f32.vlgmr.msra.gmra.mrb[38].mxu1 %vm164_vm2, %v1688_v14 }
 0x676   :  { %v1365_v17 = vmul.f32 %v1362_v16, %v1350_v3  ;;  %2053 = vmatpush3.bf16.msra.mxu0 %v2052_v15  ;;  %1991 = vmatprep.mubr.msk.f32.mxu1 %vm2136_vm1, %v2135_v2 }
 0x677   :  { %2001 = vmatprep.subr.mxu0 %v2135_v2 }
 0x679   :  { %1992 = vmatmul.mubr.msk.f32.gmra.mrb[40].mxu1 %vm164_vm2, %v1689_v18 }
 0x67a   :  { %2002 = vmatpush3.msra.mxu0 %v1365_v17  ;;  %1994 = vmatprep.mubr.msk.f32.mxu1 %vm2136_vm1, %v2135_v2 }
 0x67b   :  { %2004 = vmatmul.mubr.msk.f32.vlgmr.msra.gmra.mrb[40].mxu0 %vm164_vm2, %v1688_v14 }
 0x67c   :  { %2006 = vmatprep.mubr.msk.f32.mxu0 %vm2136_vm1, %v2135_v2 }
 0x67d   :  { %1995 = vmatmul.mubr.msk.f32.gmra.mrb[42].mxu1 %vm164_vm2, %v1690_v19 }
 0x67f   :  { %2007 = vmatmul.mubr.msk.f32.gmra.mrb[42].mxu0 %vm164_vm2, %v1689_v18 }
 0x680   :  { %2009 = vmatprep.mubr.msk.f32.mxu0 %vm2136_vm1, %v2135_v2 }
 0x683   :  { %2010 = vmatmul.mubr.msk.f32.gmra.mrb[44].mxu0 %vm164_vm2, %v1690_v19 }
 0x748   :  { %v1464_v21 = vpop.f32.mrb[38].mxu1 }
 0x749   :  { %v1465_v22 = vadd.f32 %v1464_v21, %v1377_v20  ;;  %v1990_v23 = vpop.f32.mrb[39].mxu1 }
 0x74b   :  { %2105 = vtanh.f32 %v1465_v22 }
 0x74c   :  { %v1469_v25 = vpop.f32.mrb[40].mxu1 }
 0x74d   :  { %v1470_v26 = vadd.f32 %v1469_v25, %v1382_v24  ;;  %v1993_v27 = vpop.f32.mrb[41].mxu1 }
 0x74e   :  { %v1544_v28 = vpop.f32.mrb[40].mxu0 }
 0x74f   :  { %2107 = vtanh.f32 %v1470_v26  ;;  %v2005_v29 = vpop.f32.mrb[41].mxu0 }
 0x750   :  { %v1474_v31 = vpop.f32.mrb[42].mxu1 }
 0x751   :  { %v1475_v32 = vadd.f32 %v1474_v31, %v1387_v30  ;;  %v1996_v34 = vpop.f32.mrb[43].mxu1 }
 0x752   :  { %v1549_v35 = vpop.f32.mrb[42].mxu0 }
 0x753   :  { %2109 = vtanh.f32 %v1475_v32  ;;  %v2008_v2 = vpop.f32.mrb[43].mxu0 }
 0x755   :  { %v2106_v36 = vpop.eup %2105 }
 0x756   :  { %v1561_v37 = vmul.f32 %v2106_v36, %v2106_v36  ;;  %v1554_v38 = vpop.f32.mrb[44].mxu0 }
 0x757   :  { %v2011_v39 = vpop.f32.mrb[45].mxu0 }
 0x758   :  { %v1564_v40 = vsub.f32 1.0, %v1561_v37 }
 0x759   :  { %v2108_v41 = vpop.eup %2107 }
 0x75a   :  { %v1567_v42 = vmul.f32 %v1564_v40, %v1544_v28  ;;  %v1562_v43 = vmul.f32 %v2108_v41, %v2108_v41 }
 0x75c   :  { %v1565_v44 = vsub.f32 1.0, %v1562_v43  ;;  %v1589_v33 = vmul.f32 %v1577_v46, %v1567_v42 }
 0x75d   :  { %v2110_v45 = vpop.eup %2109 }
 0x75e   :  { %v1568_v47 = vmul.f32 %v1565_v44, %v1549_v35  ;;  %v1563_v48 = vmul.f32 %v2110_v45, %v2110_v45 }
 0x760   :  { %v1590_v50 = vmul.f32 %v1582_v49, %v1568_v47  ;;  %v1566_v51 = vsub.f32 1.0, %v1563_v48 }
 0x762   :  { %v1592_v52 = vadd.f32 %v1590_v50, %v1589_v33  ;;  %v1569_v53 = vmul.f32 %v1566_v51, %v1554_v38 }
 0x764   :  { %v1591_v55 = vmul.f32 %v1587_v54, %v1569_v53 }
 0x766   :  { %v1593_v56 = vadd.f32 %v1592_v52, %v1591_v55 }
 0x768   :  { %v1594_v57 = vrot.slane %v1593_v56, 4 }
 0x76a   :  { %v1595_v58 = vadd.f32 %v1594_v57, %v1593_v56 }
 0x76c   :  { %v1596_v59 = vrot.slane %v1595_v58, 2 }
 0x76e   :  { %v1597_v60 = vadd.f32 %v1596_v59, %v1595_v58 }
 0x770   :  { %v1598_v61 = vrot.slane %v1597_v60, 1 }
 0x772   :  { %v1599_v62 = vadd.f32 %v1598_v61, %v1597_v60 }
 0x774   :  { %v1600_v63 = vmul.f32 100.0, %v1599_v62 }
 0x776   :  { %1601 = vst [vmem:[#allocation2] sm:$0x1] %v1600_v63 }
 0x777   :  { %2122 = shalt.err (!%p2119_p4)
}
 0x778   :  { %s2123_s10 = scalar_lea.hbm %s2502_s4, 16 }
 0x779   :  { %p2124_p5 = scmp.ne.s32.totalorder %s2502_s4, %s2123_s10  ;;  %p2127_p6 = scmp.lt.u32.totalorder %s2123_s10, %s2502_s4 }
 0x77b   :  { %p2129_p7 = pnand %p2127_p6, %p2124_p5 }
 0x77d   :  { %2132 = shalt.err (!%p2129_p7)
}
 0x77e   :  { %1611 = dma.vmem_to_hbm [thread:$0]  %s1609_s5, 16, %s2502_s4, [#allocation3]  }
 0x77f   :  { %2133 = dma.done.wait [#allocation3], 16  }
 0x780   :  { %2134 = vsyncadd [#allocation3], 4294967280 }
 0x781   :  { %1615 = vsyncpa [#allocation3], 1 }

</bundles_post_ra>
